<compile_context>
chip_gen: v6e
topology: v6e:2x2x1
jax: 0.10.0
libtpu: 0.0.40
codegen_flags: <defaults>
</compile_context>

<pallas_src>
import math

import jax
import jax.numpy as jnp
from jax.experimental import pallas as pl
from jax.experimental.pallas import tpu as pltpu


_INV_SQRT2 = 1.0 / math.sqrt(2.0)


def _round_up(x, m):
    return (x + m - 1) // m * m


def _vmem_capacity_bytes():
    """Per-core VMEM capacity (generation aware) with a conservative fallback."""
    try:
        return int(pltpu.get_tpu_info().vmem_capacity_bytes)
    except Exception:
        return 64 << 20  # v7x per-TensorCore VMEM; safe lower bound everywhere


def _gelu_exact(h):
    # Exact (erf) GELU in f32, matching PyTorch nn.GELU() default.
    return 0.5 * h * (1.0 + jax.lax.erf(h * jnp.float32(_INV_SQRT2)))


def _ffn_resident_kernel(x_ref, w1_ref, b1_ref, w2_ref, b2_ref, o_ref):
    """Weights resident in VMEM: both matmuls + GELU per row tile (no reduction axis)."""
    h = jnp.dot(x_ref[...], w1_ref[...], preferred_element_type=jnp.float32)
    h = h + b1_ref[...]
    g = _gelu_exact(h)
    out = jnp.dot(g.astype(w2_ref.dtype), w2_ref[...],
                  preferred_element_type=jnp.float32)
    o_ref[...] = (out + b2_ref[...]).astype(o_ref.dtype)


def _ffn_tiled_kernel(x_ref, w1_ref, b1_ref, w2_ref, b2_ref, o_ref, *maybe_acc):
    """Hidden dim tiled on a trailing 'arbitrary' axis with f32 accumulation.

    If no scratch ref is supplied, the (f32) output block itself is the
    accumulator (it is resident across the k axis: index_map (i, 0)).
    """
    acc_ref = maybe_acc[0] if maybe_acc else o_ref
    k = pl.program_id(1)

    @pl.when(k == 0)
    def _init():
        acc_ref[...] = jnp.zeros_like(acc_ref)

    h = jnp.dot(x_ref[...], w1_ref[...], preferred_element_type=jnp.float32)
    h = h + b1_ref[...]
    g = _gelu_exact(h)
    acc_ref[...] += jnp.dot(g.astype(w2_ref.dtype), w2_ref[...],
                            preferred_element_type=jnp.float32)

    @pl.when(k == pl.num_programs(1) - 1)
    def _finalize():
        o_ref[...] = (acc_ref[...] + b2_ref[...]).astype(o_ref.dtype)


def feed_forward(x, w1, b1, w2, b2, *, block_rows=1024, block_hidden=512,
                 compute_dtype=jnp.bfloat16, force_hidden_tiling=False):
    """FeedForward: GELU(x @ w1 + b1) @ w2 + b2.

    x:  [batch, seq, dim]
    w1: [dim, hidden]   b1: [hidden]     (already transposed vs. PyTorch Linear)
    w2: [hidden, dim]   b2: [dim]

    compute_dtype: MXU input dtype (default bf16 = native MXU rate on
                   v5e/v6e/v7x, half the weight HBM bytes); accumulation f32.
    NOTE: for repeated calls with the same weights, hoist the padding/cast of
          w1/w2/b1/b2 out of the hot path (they are pure layout ops).
    """
    batch, seq, dim = x.shape
    hidden = w1.shape[1]
    rows = batch * seq
    out_dtype = jnp.dtype(x.dtype)
    cdt = jnp.dtype(compute_dtype)
    cb = cdt.itemsize
    ob = out_dtype.itemsize

    # Lane-dense padded sizes (last dim multiple of 128, rows multiple of 8).
    dim_p = _round_up(dim, 128)
    hid_p = _round_up(hidden, 128)

    # Row tile: large for arithmetic intensity when weights are streamed, but
    # always leave >= 2 row tiles so both v7x TensorCores get work.
    rows_r = _round_up(rows, 8)
    tm = min(_round_up(block_rows, 8), rows_r)
    if rows_r // tm < 2 and rows_r >= 16:
        tm = _round_up(rows_r // 2, 8)

    budget = int(0.75 * _vmem_capacity_bytes())   # leave Mosaic scratch headroom

    def resident_est(tm_):
        return (2 * tm_ * dim_p * cb              # x tiles (double buffered)
                + 2 * tm_ * dim_p * ob            # out tiles
                + 2 * 2 * dim_p * hid_p * cb      # w1 + w2 (counted double buffered)
                + 2 * 8 * (hid_p + dim_p) * 4     # biases (sublane padded, f32)
                + tm_ * hid_p * (4 + cb))         # h (f32) + g (compute dtype)

    def tiled_est(tm_, th_):
        return (2 * tm_ * dim_p * cb
                + 2 * tm_ * dim_p * ob
                + 2 * 2 * dim_p * th_ * cb        # w1/w2 hidden chunks (double buf)
                + 2 * 8 * (th_ + dim_p) * 4
                + tm_ * dim_p * 4                 # f32 accumulator (scratch or out)
                + tm_ * th_ * (4 + cb))           # h / g intermediates

    use_resident = (not force_hidden_tiling) and resident_est(tm) <= budget

    if use_resident:
        th = hid_p
        hid_pad = hid_p
        est = resident_est(tm)
    else:
        th = min(max(_round_up(block_hidden, 128), 128), hid_p)
        # Shrink tiles until the working set fits the per-generation budget.
        while tiled_est(tm, th) > budget and (th > 128 or tm > 64):
            if th > 128:
                th = max(128, th // 2)
            elif tm > 64:
                tm = max(64, _round_up(tm // 2, 8))
        hid_pad = _round_up(hidden, th)
        est = tiled_est(tm, th)

    rows_p = _round_up(rows, tm)
    vmem_limit = min(max(32 << 20, int(1.2 * est)), budget)

    # Zero-pad to tiled shapes (zeros are inert: gelu(0) = 0) and cast MXU inputs.
    x2d = jnp.pad(x.reshape(rows, dim),
                  ((0, rows_p - rows), (0, dim_p - dim))).astype(cdt)
    w1p = jnp.pad(w1, ((0, dim_p - dim), (0, hid_pad - hidden))).astype(cdt)
    w2p = jnp.pad(w2, ((0, hid_pad - hidden), (0, dim_p - dim))).astype(cdt)
    b1p = jnp.pad(b1.astype(jnp.float32).reshape(1, hidden),
                  ((0, 0), (0, hid_pad - hidden)))
    b2p = jnp.pad(b2.astype(jnp.float32).reshape(1, dim),
                  ((0, 0), (0, dim_p - dim)))

    n_row_tiles = rows_p // tm
    weight_bytes = (w1p.size + w2p.size) * cb
    weight_passes = 1 if use_resident else n_row_tiles
    cost = pl.CostEstimate(
        flops=4 * rows_p * dim_p * hid_pad,            # two matmuls
        transcendentals=rows_p * hid_pad,              # erf (advisory)
        bytes_accessed=(x2d.size * cb + weight_passes * weight_bytes
                        + b1p.size * 4 + b2p.size * 4 + rows_p * dim_p * ob),
    )

    if use_resident:
        out2d = pl.pallas_call(
            _ffn_resident_kernel,
            out_shape=jax.ShapeDtypeStruct((rows_p, dim_p), out_dtype),
            grid_spec=pltpu.PrefetchScalarGridSpec(
                num_scalar_prefetch=0,
                grid=(n_row_tiles,),
                in_specs=[
                    pl.BlockSpec((tm, dim_p), lambda i: (i, 0)),       # x row tile
                    pl.BlockSpec((dim_p, hid_pad), lambda i: (0, 0)),  # w1 (resident)
                    pl.BlockSpec((1, hid_pad), lambda i: (0, 0)),      # b1 (resident)
                    pl.BlockSpec((hid_pad, dim_p), lambda i: (0, 0)),  # w2 (resident)
                    pl.BlockSpec((1, dim_p), lambda i: (0, 0)),        # b2 (resident)
                ],
                out_specs=pl.BlockSpec((tm, dim_p), lambda i: (i, 0)),
            ),
            compiler_params=pltpu.CompilerParams(
                dimension_semantics=("parallel",),
                vmem_limit_bytes=vmem_limit,
            ),
            cost_estimate=cost,
        )(x2d, w1p, b1p, w2p, b2p)
    else:
        # f32 outputs accumulate straight into the resident output block; other
        # output dtypes get a separate f32 VMEM accumulator.
        direct_acc = out_dtype == jnp.dtype(jnp.float32)
        scratch = [] if direct_acc else [pltpu.VMEM((tm, dim_p), jnp.float32)]
        out2d = pl.pallas_call(
            _ffn_tiled_kernel,
            out_shape=jax.ShapeDtypeStruct((rows_p, dim_p), out_dtype),
            grid_spec=pltpu.PrefetchScalarGridSpec(
                num_scalar_prefetch=0,
                grid=(n_row_tiles, hid_pad // th),
                in_specs=[
                    pl.BlockSpec((tm, dim_p), lambda i, k: (i, 0)),    # x row tile
                    pl.BlockSpec((dim_p, th), lambda i, k: (0, k)),    # w1 hidden chunk
                    pl.BlockSpec((1, th), lambda i, k: (0, k)),        # b1 hidden chunk
                    pl.BlockSpec((th, dim_p), lambda i, k: (k, 0)),    # w2 hidden chunk
                    pl.BlockSpec((1, dim_p), lambda i, k: (0, 0)),     # b2 (resident)
                ],
                out_specs=pl.BlockSpec((tm, dim_p), lambda i, k: (i, 0)),
                scratch_shapes=scratch,
            ),
            compiler_params=pltpu.CompilerParams(
                dimension_semantics=("parallel", "arbitrary"),
                vmem_limit_bytes=vmem_limit,
            ),
            cost_estimate=cost,
        )(x2d, w1p, b1p, w2p, b2p)

    return out2d[:rows, :dim].reshape(batch, seq, dim)


def _reference(x, w1, b1, w2, b2):
    x2d = x.reshape(-1, x.shape[-1])
    h = jnp.dot(x2d, w1, precision=jax.lax.Precision.HIGHEST) + b1
    g = 0.5 * h * (1.0 + jax.lax.erf(h * jnp.float32(_INV_SQRT2)))
    out = jnp.dot(g, w2, precision=jax.lax.Precision.HIGHEST) + b2
    return out.reshape(x.shape)


if __name__ == "__main__":
    # Small shapes consistent with FeedForward(dim, hidden_dim).
    batch, seq, dim, hidden = 2, 8, 64, 256

    key = jax.random.PRNGKey(0)
    kx, kw1, kb1, kw2, kb2 = jax.random.split(key, 5)

    x = jax.random.normal(kx, (batch, seq, dim), dtype=jnp.float32)

    # Deterministic parameter init mimicking nn.Linear's uniform(+-1/sqrt(fan_in)).
    bound1 = 1.0 / math.sqrt(dim)
    w1 = jax.random.uniform(kw1, (dim, hidden), jnp.float32, -bound1, bound1)
    b1 = jax.random.uniform(kb1, (hidden,), jnp.float32, -bound1, bound1)
    bound2 = 1.0 / math.sqrt(hidden)
    w2 = jax.random.uniform(kw2, (hidden, dim), jnp.float32, -bound2, bound2)
    b2 = jax.random.uniform(kb2, (dim,), jnp.float32, -bound2, bound2)

    ref = _reference(x, w1, b1, w2, b2)

    # 1) Default path: bf16 MXU inputs, weights-resident fast path.
    out_bf16 = jax.block_until_ready(feed_forward(x, w1, b1, w2, b2))
    assert out_bf16.shape == (batch, seq, dim)
    assert out_bf16.dtype == x.dtype
    assert jnp.allclose(out_bf16, ref, atol=3e-2, rtol=3e-2), "bf16 path mismatch"

    # 2) f32 compute, weights-resident path (tight check).
    out_f32 = jax.block_until_ready(
        feed_forward(x, w1, b1, w2, b2, compute_dtype=jnp.float32))
    assert jnp.allclose(out_f32, ref, atol=1e-4, rtol=1e-4), "f32 resident mismatch"

    # 3) f32 compute, forced hidden-reduction (tiled) path with >1 reduction step,
    #    exercising the accumulate-into-output kernel variant.
    out_tiled = jax.block_until_ready(
        feed_forward(x, w1, b1, w2, b2, compute_dtype=jnp.float32,
                     force_hidden_tiling=True, block_hidden=128))
    assert jnp.allclose(out_tiled, ref, atol=1e-4, rtol=1e-4), "f32 tiled mismatch"

    print("KERNEL_OK")
</pallas_src>

<mosaic_0001>
module attributes {stable_mosaic.version = 11 : i64} {
  func.func @_ffn_resident_kernel(%arg0: i32, %arg1: memref<8x128xbf16, #tpu.memory_space<vmem>>, %arg2: memref<128x256xbf16, #tpu.memory_space<vmem>>, %arg3: memref<1x256xf32, #tpu.memory_space<vmem>>, %arg4: memref<256x128xbf16, #tpu.memory_space<vmem>>, %arg5: memref<1x128xf32, #tpu.memory_space<vmem>>, %arg6: memref<8x128xf32, #tpu.memory_space<vmem>>) attributes {dimension_semantics = [#tpu.dimension_semantics<parallel>], iteration_bounds = array<i64: 2>, scalar_prefetch = 0 : i64, scratch_operands = 0 : i64, tpu.core_type = #tpu.core_type<tc>, window_params = [{transform_indices = @transform_0, window_bounds = array<i64: 8, 128>}, {pipeline_mode = #tpu.pipeline_mode<synchronous>, transform_indices = @transform_1, window_bounds = array<i64: 128, 256>}, {pipeline_mode = #tpu.pipeline_mode<synchronous>, transform_indices = @transform_2, window_bounds = array<i64: 1, 256>}, {pipeline_mode = #tpu.pipeline_mode<synchronous>, transform_indices = @transform_3, window_bounds = array<i64: 256, 128>}, {pipeline_mode = #tpu.pipeline_mode<synchronous>, transform_indices = @transform_4, window_bounds = array<i64: 1, 128>}, {transform_indices = @transform_5, window_bounds = array<i64: 8, 128>}]} {
    %c0 = arith.constant 0 : index
    %c0_0 = arith.constant 0 : index
    %0 = vector.load %arg1[%c0, %c0_0] : memref<8x128xbf16, #tpu.memory_space<vmem>>, vector<8x128xbf16>
    %c0_1 = arith.constant 0 : index
    %c0_2 = arith.constant 0 : index
    %1 = vector.load %arg2[%c0_1, %c0_2] : memref<128x256xbf16, #tpu.memory_space<vmem>>, vector<128x256xbf16>
    %cst = arith.constant dense<0.000000e+00> : vector<8x256xf32>
    %2 = tpu.matmul %0, %1, %cst {dimension_numbers = #tpu.dot_dimension_numbers<[1], [0], [0], [1], [0, 0, 1, 1], [], []>} : vector<8x128xbf16>, vector<128x256xbf16>, vector<8x256xf32> -> vector<8x256xf32>
    %c0_3 = arith.constant 0 : index
    %c0_4 = arith.constant 0 : index
    %3 = vector.load %arg3[%c0_3, %c0_4] : memref<1x256xf32, #tpu.memory_space<vmem>>, vector<1x256xf32>
    %4 = vector.broadcast %3 : vector<1x256xf32> to vector<8x256xf32>
    %5 = arith.addf %2, %4 : vector<8x256xf32>
    %cst_5 = arith.constant 5.000000e-01 : f32
    %6 = vector.broadcast %cst_5 : f32 to vector<8x256xf32>
    %7 = arith.mulf %6, %5 : vector<8x256xf32>
    %cst_6 = arith.constant 0.707106769 : f32
    %8 = vector.broadcast %cst_6 : f32 to vector<8x256xf32>
    %9 = arith.mulf %5, %8 : vector<8x256xf32>
    %10 = math.erf %9 : vector<8x256xf32>
    %cst_7 = arith.constant 1.000000e+00 : f32
    %11 = vector.broadcast %cst_7 : f32 to vector<8x256xf32>
    %12 = arith.addf %11, %10 : vector<8x256xf32>
    %13 = arith.mulf %7, %12 : vector<8x256xf32>
    %14 = arith.truncf %13 : vector<8x256xf32> to vector<8x256xbf16>
    %c0_8 = arith.constant 0 : index
    %c0_9 = arith.constant 0 : index
    %15 = vector.load %arg4[%c0_8, %c0_9] : memref<256x128xbf16, #tpu.memory_space<vmem>>, vector<256x128xbf16>
    %cst_10 = arith.constant dense<0.000000e+00> : vector<8x128xf32>
    %16 = tpu.matmul %14, %15, %cst_10 {dimension_numbers = #tpu.dot_dimension_numbers<[1], [0], [0], [1], [0, 0, 1, 1], [], []>} : vector<8x256xbf16>, vector<256x128xbf16>, vector<8x128xf32> -> vector<8x128xf32>
    %c0_11 = arith.constant 0 : index
    %c0_12 = arith.constant 0 : index
    %17 = vector.load %arg5[%c0_11, %c0_12] : memref<1x128xf32, #tpu.memory_space<vmem>>, vector<1x128xf32>
    %18 = vector.broadcast %17 : vector<1x128xf32> to vector<8x128xf32>
    %19 = arith.addf %16, %18 : vector<8x128xf32>
    %c0_13 = arith.constant 0 : index
    %c0_14 = arith.constant 0 : index
    %20 = vector.load %arg6[%c0_13, %c0_14] : memref<8x128xf32, #tpu.memory_space<vmem>>, vector<8x128xf32>
    tpu.vector_store %arg6[%c0_13, %c0_14], %19 {strides = array<i32>} : memref<8x128xf32, #tpu.memory_space<vmem>>, vector<8x128xf32>,
    return
  }
  func.func @transform_0(%arg0: i32) -> (i32, i32) {
    %c0_i32 = arith.constant 0 : i32
    %c0_i32_0 = arith.constant 0 : i32
    return %arg0, %c0_i32 : i32, i32
  }
  func.func @transform_1(%arg0: i32) -> (i32, i32) {
    %c0_i32 = arith.constant 0 : i32
    %c0_i32_0 = arith.constant 0 : i32
    %c0_i32_1 = arith.constant 0 : i32
    return %c0_i32, %c0_i32_0 : i32, i32
  }
  func.func @transform_2(%arg0: i32) -> (i32, i32) {
    %c0_i32 = arith.constant 0 : i32
    %c0_i32_0 = arith.constant 0 : i32
    %c0_i32_1 = arith.constant 0 : i32
    return %c0_i32, %c0_i32_0 : i32, i32
  }
  func.func @transform_3(%arg0: i32) -> (i32, i32) {
    %c0_i32 = arith.constant 0 : i32
    %c0_i32_0 = arith.constant 0 : i32
    %c0_i32_1 = arith.constant 0 : i32
    return %c0_i32, %c0_i32_0 : i32, i32
  }
  func.func @transform_4(%arg0: i32) -> (i32, i32) {
    %c0_i32 = arith.constant 0 : i32
    %c0_i32_0 = arith.constant 0 : i32
    %c0_i32_1 = arith.constant 0 : i32
    return %c0_i32, %c0_i32_0 : i32, i32
  }
  func.func @transform_5(%arg0: i32) -> (i32, i32) {
    %c0_i32 = arith.constant 0 : i32
    %c0_i32_0 = arith.constant 0 : i32
    return %arg0, %c0_i32 : i32, i32
  }
}

</mosaic_0001>

<bundles_post_ra>
// kernel: tpu_custom_call.1
= control target key start
LH: loop header
LB: loop body
LE: loop exit
PB: predicated region body
PF: predicated region fallthrough
CT: control target
= control target key end

     0   :  { %10 = vsyncpa [#allocation3], 0  ;;  %s1268_s0 = inlined_call_operand.hbm [shape: bf16[16,128], index: 0, kind: input, shape index: {}]   ;;  %s1269_s1 = inlined_call_operand.hbm [shape: bf16[128,256], index: 1, kind: input, shape index: {}]   ;;  %s1270_s2 = inlined_call_operand.vmem [shape: f32[1,256], index: 2, kind: input, shape index: {}]   ;;  %s1271_s3 = inlined_call_operand.hbm [shape: bf16[256,128], index: 3, kind: input, shape index: {}]   ;;  %s1272_s4 = inlined_call_operand.vmem [shape: f32[1,128], index: 4, kind: input, shape index: {}]   ;;  %s1273_s5 = inlined_call_operand.hbm [shape: f32[16,128], index: 5, kind: output, shape index: {}]  }
   0x1   :  { %12 = vsyncpa [#allocation3 + $0x1], 0 }
   0x2   :  { %13 = vsyncpa [#allocation6], 0 }
   0x3   :  { %14 = vsyncpa [#allocation4], 0 }
   0x4   :  { %16 = vsyncpa [#allocation4 + $0x1], 0  ;;  %s1087_s18 = smov 0   ;;  %s1089_s19 = smov 0  }
   0x5   :  { %s1091_s20 = smov 0   ;;  %s1093_s21 = smov 0  }
   0x6 LB: > { %s1108_s22 = sadd.s32 4294967295, %s1046_s21   ;;  %s711_s23 = sadd.s32 4294967294, %s1046_s21   ;;  %s1046_s21 = sphi %s1093_s21, %s1295_s21   ;;  %s1042_s20 = sphi %s1091_s20, %s1294_s20   ;;  %s1038_s19 = sphi %s1089_s19, %s1293_s19   ;;  %s1034_s18 = sphi %s1087_s18, %s1292_s18  }
   0x7   : > { %p42_p0 = scmp.ne.s32.totalorder %s1038_s19, %s1034_s18  ;;  %p1274_p1 = scmp.eq.s32.totalorder %s1108_s22, 0 }
   0x8   : > { %p156_p3 = scmp.eq.s32.totalorder %s711_s23, 1  ;;  %p712_p5 = scmp.ge.s32.totalorder %s1046_s21, 1 }
   0x9   : > { %p1117_p4 = por %p1274_p1, %p42_p0  ;;  %p163_p7 = scmp.lt.s32.totalorder %s1046_s21, 3 }
   0xa   : > { %p1122_p6 = por %p156_p3, %p42_p0  ;;  %s1048_s27 = smov [#allocation5]  }
   0xb   : > { %s1278_s24 = scalar_select %p1117_p4, 1, 0 }
   0xc   : > { %s1279_s25 = scalar_select %p1122_p6, 1, 0 }
   0xd   : > { %p1127_p8 = pnand %p712_p5, %p163_p7  ;;  %s175_s28 = sshll.u32 %s1048_s27, 4  ;;  %s176_s28 = int_to_ptr.vmem [resolvable:$true] %s175_s28 }
   0xe   : > { %s1049_s30 = smov [#allocation7]   ;;  %s909_s7 = scalar_lea.vmem %s176_s28, 2048 }
   0xf   : > { %s1280_s26 = scalar_select %p1127_p8, 1, 0 }
  0x10   : > { %p794_p9 = pneg %p1127_p8  ;;  %s191_s6 = sshll.u32 %s1049_s30, 4  ;;  %s192_s6 = int_to_ptr.vmem [resolvable:$true] %s191_s6 }
  0x11   : > { %p910_p13 = scmp.ne.s32.totalorder %s176_s28, %s909_s7  ;;  %p917_p5 = scmp.lt.s32.totalorder %s176_s28, %s176_s28 }
  0x12   : > { %p1136_p11 = pnand %p794_p9, %p1274_p1  ;;  %p918_p7 = scmp.lt.s32.totalorder %s909_s7, %s909_s7 }
  0x14   : > { %p900_p12 = pneg %p1136_p11  ;;  %p919_p10 = por %p918_p7, %p917_p5 }
  0x16   : > { %p912_p0 = pnand %p910_p13, %p900_p12 }
  0x18   : > { %p913_p3 = pneg %p912_p0 }
  0x1a   : > { %p920_p9 = pnand %p919_p10, %p913_p3 }
  0x1c   : > { %923 = shalt.err (!%p920_p9)
}
  0x1d   : > { %s1050_s8 = smov 128   ;;  %s1051_s9 = smov 8  }
  0x1e   : > { %797 = dma.hbm_to_vmem [thread:$0]  (!%p1136_p11), %s1269_s1, 2048, %s176_s28, [#allocation6], %s1050_s8, %s1050_s8, %s1051_s9  }
  0x1f   : > { %s935_s12 = scalar_lea.vmem %s192_s6, 2048  ;;  %p943_p2 = scmp.lt.s32.totalorder %s192_s6, %s192_s6 }
  0x20   : > { %p936_p1 = scmp.ne.s32.totalorder %s192_s6, %s935_s12  ;;  %p944_p6 = scmp.lt.s32.totalorder %s935_s12, %s935_s12 }
  0x22   : > { %p938_p13 = pnand %p936_p1, %p900_p12  ;;  %p945_p5 = por %p944_p6, %p943_p2 }
  0x24   : > { %p939_p0 = pneg %p938_p13 }
  0x26   : > { %p946_p10 = pnand %p945_p5, %p939_p0 }
  0x28   : > { %949 = shalt.err (!%p946_p10)
}
  0x29   : > { %s1052_s13 = smov 64   ;;  %s1053_s14 = smov 4  }
  0x2a   : > { %800 = dma.hbm_to_vmem [thread:$0]  (!%p1136_p11), %s1271_s3, 2048, %s192_s6, [#allocation6], %s1052_s13, %s1052_s13, %s1053_s14  }
  0x2b   : > { %s1159_s17 = sadd.s32 1, %s1046_s21   ;;  %s29_s27 = sadd.s32 1, %s1042_s20 }
  0x2c   : > { %s26_s23 = ssub.s32 %s1046_s21, %s1159_s17  ;;  %p36_p2 = scmp.ne.s32.totalorder %s1042_s20, %s1038_s19 }
  0x2d   : > { %p27_p1 = scmp.eq.s32.totalorder %s26_s23, 0  ;;  %p37_p6 = scmp.eq.s32.totalorder %s1046_s21, 0 }
  0x2e   : > { %p1282_p3 = scmp.eq.s32.totalorder %s1108_s22, 1  ;;  %p811_p9 = scmp.lt.s32.totalorder %s1046_s21, 2 }
  0x2f   : > { %s1168_s28 = scalar_select %p27_p1, %s1042_s20, %s29_s27  }
  0x30   : > { %p38_p12 = por %p37_p6, %p36_p2  ;;  %p1172_p7 = por %p1282_p3, %p36_p2 }
  0x31   : > { %s208_s29 = sand.u32 1, %s1042_s20   ;;  %s717_s6 = sshll.u32 %s1046_s21, 6 }
  0x32   : > { %s1283_s30 = scalar_select %p1172_p7, 1, 0 }
  0x33   : > { %s716_s7 = sshll.u32 %s208_s29, 2  ;;  %s1182_s10 = scalar_lea.hbm %s1268_s0, %s717_s6 }
  0x34   : > { %s212_s11 = scalar_lea.vmem [#allocation2], %s716_s7  ;;  %p1184_p11 = pnand %p811_p9, %p38_p12 }
  0x35   : > { %s219_s12 = sshll.u32 %s212_s11, 4  ;;  %s209_s14 = scalar_lea.sflag [#allocation3], %s208_s29  ;;  %s220_s12 = int_to_ptr.vmem [resolvable:$true] %s219_s12 }
  0x36   : > { %s950_s15 = scalar_lea.hbm %s1182_s10, 64  ;;  %p952_p0 = pneg %p1184_p11 }
  0x37   : > { %p951_p13 = scmp.ne.s32.totalorder %s1182_s10, %s950_s15  ;;  %s955_s27 = scalar_lea.hbm %s1268_s0, 128 }
  0x38   : > { %p956_p1 = scmp.lt.s32.totalorder %s1182_s10, %s1268_s0  ;;  %p957_p2 = scmp.lt.s32.totalorder %s955_s27, %s950_s15 }
  0x39   : > { %p953_p5 = pnand %p952_p0, %p951_p13 }
  0x3a   : > { %p958_p6 = por %p957_p2, %p956_p1 }
  0x3b   : > { %p954_p10 = pneg %p953_p5 }
  0x3d   : > { %p959_p12 = pnand %p958_p6, %p954_p10 }
  0x3f   : > { %962 = shalt.err (!%p959_p12)
}
  0x40   : > { %s963_s8 = scalar_lea.vmem %s220_s12, 64  ;;  %s1054_s29 = smov [#allocation2]  }
  0x41   : > { %p964_p3 = scmp.ne.s32.totalorder %s220_s12, %s963_s8  ;;  %s968_s9 = sshll.u32 %s1054_s29, 4  ;;  %s969_s9 = int_to_ptr.vmem [resolvable:$false] %s968_s9 }
  0x42   : > { %s970_s11 = scalar_lea.vmem %s969_s9, 128  ;;  %p971_p13 = scmp.lt.s32.totalorder %s220_s12, %s969_s9 }
  0x43   : > { %p966_p9 = pnand %p964_p3, %p952_p0  ;;  %p972_p5 = scmp.lt.s32.totalorder %s970_s11, %s963_s8 }
  0x45   : > { %p967_p7 = pneg %p966_p9  ;;  %p973_p4 = por %p972_p5, %p971_p13 }
  0x47   : > { %p974_p8 = pnand %p973_p4, %p967_p7 }
  0x49   : > { %977 = shalt.err (!%p974_p8)
}
  0x4a   : > { %804 = dma.hbm_to_vmem [thread:$0]  (!%p1184_p11), %s1182_s10, 64, %s220_s12, %s209_s14  }
  0x4b   : > { %p1285_p10 = scmp.ne.s32.totalorder %s1280_s26, 0 }
  0x4c   : > { %s1205_s15 = sand.u32 (!%p1285_p10), 1, %s1038_s19   ;;  %p1286_p0 = scmp.ne.s32.totalorder (!%p1285_p10), %s1278_s24, 0 }
  0x4d   : > { %228 = sbr.rel (%p1285_p10) target bundleno = 551 (0x227), region = 40  ;;  %s719_s16 = sshll.u32 (!%p1285_p10), %s1205_s15, 2 }
  0x4e   : > { %s231_s23 = scalar_lea.sflag (!%p1285_p10), [#allocation3], %s1205_s15  ;;  %s1209_s27 = scalar_lea.vmem (!%p1285_p10), [#allocation2], %s719_s16 }
  0x52   : > { %1021 = dma.done.wait (%p1286_p0), %s231_s23, 64  }
  0x53   : > { %1023 = vsyncadd (%p1286_p0), %s231_s23, 4294967232  ;;  %p1287_p4 = scmp.eq.s32.totalorder %s1108_s22, 0 }
  0x55   : > { %1025 = dma.done.wait (%p1287_p4), [#allocation6], 4096   ;;  %p1288_p8 = pmov %p1287_p4 }
  0x56   : > { %v1055_v0 = vmov 0   ;;  %v854_v1 = vld [vmem:[#allocation5 + $0x74] ss:$8 sps:$4 sm:$0xff]   ;;  %v856_v2 = vld [vmem:[#allocation5 + $0x70] ss:$8 sps:$4 sm:$0xff]   ;;  %v882_v22 = vld [vmem:[#allocation7 + $0x68] sm:$0xff]   ;;  %v289_v34 = vlaneseq }
  0x57   : > { %1027 = vsyncadd (%p1288_p8), [#allocation6], 4294963200  ;;  %411 = vmatprep.mubr.bf16.mxu0 %v1055_v0  ;;  %379 = vmatprep.subr.bf16.mxu0 %v854_v1  ;;  %v857_v3 = vld [vmem:[#allocation5 + $0x64] ss:$8 sps:$4 sm:$0xff]   ;;  %v859_v4 = vld [vmem:[#allocation5 + $0x60] ss:$8 sps:$4 sm:$0xff]  }
  0x58   : > { %380 = vmatpush1.bf16.msra.mxu0 %v856_v2  ;;  %v860_v5 = vld [vmem:[#allocation5 + $0x54] ss:$8 sps:$4 sm:$0xff]   ;;  %v862_v6 = vld [vmem:[#allocation5 + $0x50] ss:$8 sps:$4 sm:$0xff]   ;;  %v863_v7 = vld [vmem:[#allocation5 + $0x44] ss:$8 sps:$4 sm:$0xff]  }
  0x59   : > { %381 = vmatprep.subr.bf16.mxu0 %v857_v3  ;;  %v865_v8 = vld [vmem:[#allocation5 + $0x40] ss:$8 sps:$4 sm:$0xff]   ;;  %v866_v9 = vld [vmem:[#allocation5 + $0x34] ss:$8 sps:$4 sm:$0xff]   ;;  %v868_v12 = vld [vmem:[#allocation5 + $0x30] ss:$8 sps:$4 sm:$0xff]  }
  0x5a   : > { %v878_v10 = vld [vmem:[#allocation7 + $0x78] sm:$0xff]   ;;  %v869_v13 = vld [vmem:[#allocation5 + $0x24] ss:$8 sps:$4 sm:$0xff]   ;;  %v871_v14 = vld [vmem:[#allocation5 + $0x20] ss:$8 sps:$4 sm:$0xff]   ;;  %v290_v35 = vshrl.u32 %v289_v34, 7 }
  0x5b   : > { %v879_v11 = vld [vmem:[#allocation7 + $0x38] sm:$0xff]   ;;  %760 = vmatprep.subr.bf16.mxu1 %v878_v10  ;;  %v875_v17 = vld [vmem:[#allocation5 + $0x4] ss:$8 sps:$4 sm:$0xff]   ;;  %v877_v18 = vld [vmem:[#allocation5] ss:$8 sps:$4 sm:$0xff]   ;;  %s722_s10 = sshll.u32 %s1205_s15, 3 }
  0x5c   : > { %382 = vmatpush1.bf16.msra.mxu0 %v859_v4  ;;  %761 = vmatpush3.bf16.msra.mxu1 %v879_v11  ;;  %v872_v15 = vld [vmem:[#allocation5 + $0x14] ss:$8 sps:$4 sm:$0xff]   ;;  %v874_v16 = vld [vmem:[#allocation5 + $0x10] ss:$8 sps:$4 sm:$0xff]   ;;  %v883_v23 = vld [vmem:[#allocation7 + $0x28] sm:$0xff]   ;;  %v291_v36 = vsub.s32 0, %v290_v35 }
  0x5d   : > { %383 = vmatprep.subr.bf16.mxu0 %v860_v5  ;;  %v270_v19 = vld [vmem:[%s1209_s27] sm:$0xf]  ;;  %v880_v20 = vld [vmem:[#allocation7 + $0x70] sm:$0xff]   ;;  %v884_v24 = vld [vmem:[#allocation7 + $0x60] sm:$0xff]   ;;  %v295_v38 = vsub.s32 1, %v290_v35  ;;  %s757_s14 = sshll.u32 %s1108_s22, 7 }
  0x5e   : > { %v881_v21 = vld [vmem:[#allocation7 + $0x30] sm:$0xff]   ;;  %762 = vmatprep.subr.bf16.mxu1 %v880_v20  ;;  %v885_v25 = vld [vmem:[#allocation7 + $0x20] sm:$0xff]   ;;  %v886_v26 = vld [vmem:[#allocation7 + $0x58] sm:$0xff]   ;;  %s268_s6 = scalar_lea.vmem [#allocation8], %s722_s10  ;;  %s1231_s9 = scalar_lea.hbm %s1273_s5, %s757_s14 }
  0x5f   : > { %v887_v27 = vld [vmem:[#allocation7 + $0x18] sm:$0xff]   ;;  %v888_v28 = vld [vmem:[#allocation7 + $0x50] sm:$0xff]   ;;  %v890_v30 = vld [vmem:[#allocation7 + $0x48] sm:$0xff]   ;;  %s622_s7 = sshll.u32 %s268_s6, 4  ;;  %s609_s11 = scalar_lea.sflag [#allocation4], %s1205_s15  ;;  %s623_s7 = int_to_ptr.vmem [resolvable:$true] %s622_s7 }
  0x60   : > { %384 = vmatpush1.bf16.msra.mxu0 %v862_v6  ;;  %763 = vmatpush3.bf16.msra.mxu1 %v881_v21  ;;  %v889_v29 = vld [vmem:[#allocation7 + $0x10] sm:$0xff]   ;;  %v891_v31 = vld [vmem:[#allocation7 + $0x8] sm:$0xff]   ;;  %v892_v32 = vld [vmem:[#allocation7 + $0x40] sm:$0xff]   ;;  %s978_s16 = scalar_lea.vmem %s623_s7, 128  ;;  %p1289_p11 = scmp.ne.s32.totalorder %s1283_s30, 0 }
  0x61   : > { %385 = vmatprep.subr.bf16.mxu0 %v863_v7  ;;  %764 = vmatprep.subr.bf16.mxu1 %v882_v22  ;;  %v893_v33 = vld [vmem:[#allocation7] sm:$0xff]   ;;  %v287_v37 = vld [vmem:[%s1270_s2] sm:$0x3]  ;;  %p979_p7 = scmp.ne.s32.totalorder %s623_s7, %s978_s16  ;;  %s1056_s22 = smov [#allocation8]  }
  0x62   : > { %v292_v39 = vrot.slane %v287_v37, %v291_v36  ;;  %v296_v40 = vrot.slane %v287_v37, %v295_v38  ;;  %v739_v60 = vld [vmem:[%s1272_s4] ss:$0 sm:$0xff]  ;;  %s982_s23 = sshll.u32 %s1056_s22, 4  ;;  %s983_s23 = int_to_ptr.vmem [resolvable:$false] %s982_s23 }
  0x63   : > { %p980_p1 = pnand %p979_p7, %p1289_p11  ;;  %s984_s27 = scalar_lea.vmem %s983_s23, 256 }
  0x64   : > { %386 = vmatpush1.bf16.msra.mxu0 %v865_v8  ;;  %765 = vmatpush3.bf16.msra.mxu1 %v883_v23  ;;  %p985_p6 = scmp.lt.s32.totalorder %s623_s7, %s983_s23  ;;  %p986_p12 = scmp.lt.s32.totalorder %s984_s27, %s978_s16 }
  0x65   : > { %387 = vmatprep.subr.bf16.mxu0 %v866_v9  ;;  %766 = vmatprep.subr.bf16.mxu1 %v884_v24  ;;  %p981_p2 = pneg %p980_p1 }
  0x66   : > { %p987_p3 = por %p986_p12, %p985_p6 }
  0x68   : > { %388 = vmatpush1.bf16.msra.mxu0 %v868_v12  ;;  %767 = vmatpush3.bf16.msra.mxu1 %v885_v25  ;;  %p988_p9 = pnand %p987_p3, %p981_p2 }
  0x69   : > { %389 = vmatprep.subr.bf16.mxu0 %v869_v13  ;;  %768 = vmatprep.subr.bf16.mxu1 %v886_v26 }
  0x6c   : > { %390 = vmatpush1.bf16.msra.mxu0 %v871_v14  ;;  %769 = vmatpush3.bf16.msra.mxu1 %v887_v27 }
  0x6d   : > { %391 = vmatprep.subr.bf16.mxu0 %v872_v15  ;;  %770 = vmatprep.subr.bf16.mxu1 %v888_v28 }
  0x70   : > { %392 = vmatpush1.bf16.msra.mxu0 %v874_v16  ;;  %771 = vmatpush3.bf16.msra.mxu1 %v889_v29 }
  0x71   : > { %393 = vmatprep.subr.bf16.mxu0 %v875_v17  ;;  %772 = vmatprep.subr.bf16.mxu1 %v890_v30 }
  0x74   : > { %394 = vmatpush1.bf16.msra.mxu0 %v877_v18  ;;  %773 = vmatpush3.bf16.msra.mxu1 %v891_v31 }
  0x75   : > { %774 = vmatprep.subr.bf16.mxu1 %v892_v32 }
  0x77   : > { %412 = vmatmul.mubr.bf16.vlgmr.msra.gmra.mxu0 %v270_v19 }
  0x78   : > { %775 = vmatpush3.bf16.msra.mxu1 %v893_v33 }
 0x137   : > { %v413_v41 = vpop.f32.mrf.mxu0 }
 0x138   : > { %v414_v42 = vadd.f32 %v413_v41, %v292_v39 }
 0x139   : > { %v415_v43 = vpop.f32.mrf.mxu0 }
 0x13a   : > { %v422_v44 = vmul.f32 0.70710677, %v414_v42  ;;  %v416_v45 = vadd.f32 %v415_v43, %v296_v40  ;;  %v420_v52 = vmul.f32 0.5, %v414_v42 }
 0x13b   : > { %v417_v46 = vpop.f32.mrf.mxu0 }
 0x13c   : > { %894 = verf.f32 %v422_v44  ;;  %v423_v47 = vmul.f32 0.70710677, %v416_v45  ;;  %v421_v53 = vmul.f32 0.5, %v416_v45 }
 0x13d   : > { %v418_v48 = vpop.f32.mrf.mxu0 }
 0x13e   : > { %896 = verf.f32 %v423_v47 }
 0x149   : > { %v895_v49 = vpop.eup %894 }
 0x14a   : > { %v426_v50 = vadd.f32 1.0, %v895_v49 }
 0x14b   : > { %v897_v51 = vpop.eup %896 }
 0x14c   : > { %v427_v54 = vadd.f32 1.0, %v897_v51  ;;  %v428_v55 = vmul.f32 %v426_v50, %v420_v52 }
 0x14e   : > { %v429_v56 = vmul.f32 %v427_v54, %v421_v53  ;;  %v430_v58 = vpack.c.bf16 %v428_v55, %v428_v55 }
 0x150   : > { %v431_v57 = vpack.c.bf16 %v429_v56, %v429_v56 }
 0x152   : > { %599 = vmatprep.mubr.bf16.mxu1 %v431_v57 }
 0x153   : > { %600 = vmatmul.mubr.bf16.vlgmr.msra.gmra.mxu1 %v430_v58 }
 0x213   : > { %v776_v59 = vpop.f32.mrf.mxu1 }
 0x215   : > { %v777_v61 = vpop.f32.mrf.mxu1 }
 0x216   : > { %v778_v62 = vadd.f32 %v777_v61, %v776_v59 }
 0x217   : > { %v779_v63 = vpop.f32.mrf.mxu1 }
 0x218   : > { %v602_v0 = vadd.f32 %v778_v62, %v739_v60 }
 0x219   : > { %v780_v1 = vpop.f32.mrf.mxu1 }
 0x21a   : > { %607 = vst [vmem:[%s268_s6] sm:$0xff] %v602_v0 }
 0x21b   : > { %991 = shalt.err (!%p988_p9)
}
 0x21c   : > { %s992_s24 = scalar_lea.hbm %s1231_s9, 128  ;;  %s996_s10 = scalar_lea.hbm %s1273_s5, 256 }
 0x21d   : > { %p993_p13 = scmp.ne.s32.totalorder %s1231_s9, %s992_s24  ;;  %p997_p0 = scmp.lt.s32.totalorder %s1231_s9, %s1273_s5 }
 0x21e   : > { %p998_p4 = scmp.lt.s32.totalorder %s996_s10, %s992_s24 }
 0x21f   : > { %p994_p5 = pnand %p993_p13, %p1289_p11 }
 0x220   : > { %p999_p8 = por %p998_p4, %p997_p0 }
 0x221   : > { %p995_p10 = pneg %p994_p5 }
 0x223   : > { %p1000_p7 = pnand %p999_p8, %p995_p10 }
 0x225   : > { %1003 = shalt.err (!%p1000_p7)
}
 0x226   : > { %792 = dma.vmem_to_hbm [thread:$0]  (%p1289_p11), %s623_s7, 128, %s1231_s9, %s609_s11  }
 0x227 PF: > { %s634_s14 = sand.u32 1, %s1034_s18   ;;  %p1290_p1 = scmp.ne.s32.totalorder %s1279_s25, 0 }
 0x228   : > { %p1291_p2 = scmp.ge.s32.totalorder %s1046_s21, 2  ;;  %s635_s6 = scalar_lea.sflag [#allocation4], %s634_s14 }
 0x22a   : > { %p806_p6 = pnand %p1291_p2, %p1290_p1 }
 0x22c   : > { %p807_p12 = pneg %p806_p6 }
 0x22e   : > { %1029 = dma.done.wait (%p807_p12), %s635_s6, 128  }
 0x22f   : > { %1031 = vsyncadd (%p807_p12), %s635_s6, 4294967168  ;;  %p19_p3 = scmp.ge.s32.totalorder %s1159_s17, 4   ;;  %s1292_s18 = smov %s1038_s19 }
 0x230   : > { %s1293_s19 = smov %s1042_s20  ;;  %s1294_s20 = smov %s1168_s28 }
 0x231   : > { %s1295_s21 = smov %s1159_s17  ;;  %21 = sbr.rel (!%p19_p3) target bundleno = 6 (0x6), region = 93 }
 0x236   :  { %640 = vsyncpa [#allocation3], 1 }
 0x237   :  { %642 = vsyncpa [#allocation3 + $0x1], 1 }
 0x238   :  { %643 = vsyncpa [#allocation6], 1 }
 0x239   :  { %644 = vsyncpa [#allocation4], 1 }
 0x23a   :  { %646 = vsyncpa [#allocation4 + $0x1], 1 }

</bundles_post_ra>
